<compile_context>
chip_gen: v7x
topology: tpu7x:2x2x1
jax: 0.10.0
libtpu: 0.0.40
codegen_flags: <defaults>
</compile_context>

<pallas_src>
import functools

import jax
import jax.numpy as jnp
from jax.experimental import pallas as pl
from jax.experimental.pallas import tpu as pltpu

HIDDEN = 2 ** 7  # 128, per the module definition
LANE = 128
SUBLANE = 8


def _round_up(n, m):
    return (n + m - 1) // m * m


def _sigmoid(h):
    # exact sigmoid via a single EUP transcendental (tanh); avoids a VALU
    # divide on v5e's f32-only VPU.
    return 0.5 * jnp.tanh(0.5 * h) + 0.5


def _mlp_kernel(x_ref, w1_ref, w2_ref, w3_ref, b_ref, o_ref):
    # Entire 3-layer MLP fused in one body; all tiles live in VMEM.
    # Matmul operands are whatever dtype the weights were prepared in
    # (bf16 by default); accumulation + bias + sigmoid stay f32.
    op_dtype = w1_ref.dtype
    x = x_ref[...].astype(op_dtype)          # in-kernel cast: x crosses HBM once

    b = b_ref[...]                           # (3, out_p) f32, merged biases
    b1 = b[0:1, :HIDDEN]
    b2 = b[1:2, :HIDDEN]
    b3 = b[2:3, :]

    h = jnp.dot(x, w1_ref[...], preferred_element_type=jnp.float32) + b1
    h = _sigmoid(h).astype(op_dtype)
    h = jnp.dot(h, w2_ref[...], preferred_element_type=jnp.float32) + b2
    h = _sigmoid(h).astype(op_dtype)
    h = jnp.dot(h, w3_ref[...], preferred_element_type=jnp.float32) + b3
    o_ref[...] = _sigmoid(h).astype(o_ref.dtype)


def prepare_params(params, *, op_dtype=jnp.bfloat16):
    """One-time param prep (outside the per-call path).

    Pads in_dim/out_dim to multiples of 128 (lane-dense loads/stores; the
    zero padding is provably inert), casts weights to the matmul operand
    dtype, and merges the three bias vectors into a single (3, out_p) f32
    array.  Returns (prepared_params, out_dim).
    """
    w1, b1, w2, b2, w3, b3 = params
    in_dim = w1.shape[0]
    out_dim = w3.shape[1]
    in_p = _round_up(in_dim, LANE)
    out_p = _round_up(out_dim, LANE)

    w1p = jnp.pad(w1, ((0, in_p - in_dim), (0, 0))).astype(op_dtype)
    w2p = w2.astype(op_dtype)
    w3p = jnp.pad(w3, ((0, 0), (0, out_p - out_dim))).astype(op_dtype)

    bias = jnp.zeros((3, out_p), jnp.float32)
    bias = bias.at[0, :HIDDEN].set(b1[0])
    bias = bias.at[1, :HIDDEN].set(b2[0])
    bias = bias.at[2, :out_dim].set(b3[0])

    return (w1p, w2p, w3p, bias), out_dim


@functools.partial(
    jax.jit,
    static_argnames=("out_dim", "batch_tile", "return_padded", "out_dtype"))
def operator_f_forward(x, prepared, *, out_dim, batch_tile=None,
                       return_padded=False, out_dtype=jnp.float32):
    """x: (batch, in_dim) f32 (or bf16).  Returns (batch, out_dim) out_dtype.

    With return_padded=True the padded (batch_p, out_p) buffer is returned
    as-is (no post-kernel slice / extra HBM pass) for consumers that tolerate
    the padding.
    """
    w1, w2, w3, bias = prepared
    batch, in_dim = x.shape
    in_p, hidden = w1.shape
    out_p = w3.shape[1]

    # ---- pad x features to the prepared (lane-dense) in_p -----------------
    if in_p != in_dim:
        x = jnp.pad(x, ((0, 0), (0, in_p - in_dim)))

    # ---- batch tiling ------------------------------------------------------
    batch_p = _round_up(batch, SUBLANE)
    if batch_tile is None:
        if batch_p <= 256:
            # latency path: single shot, zero per-step overhead
            batch_tile = batch_p
        else:
            # at least 2 grid steps (keeps both v7x TensorCores busy) and at
            # most ~4096 rows per tile (per-step overhead amortized, working
            # set still far under VMEM for moderate in_dim)
            n_tiles = max(2, pl.cdiv(batch_p, 4096))
            batch_tile = _round_up(pl.cdiv(batch_p, n_tiles), SUBLANE)
    else:
        batch_tile = _round_up(batch_tile, SUBLANE)  # Mosaic (8,128) constraint
    batch_p = _round_up(batch_p, batch_tile)
    if batch_p != batch:
        x = jnp.pad(x, ((0, batch_p - batch), (0, 0)))

    grid = (batch_p // batch_tile,)

    def full2d(arr):
        return pl.BlockSpec(arr.shape, lambda i: (0, 0))

    # ---- scheduler hint ----------------------------------------------------
    flops = 2 * batch_p * (in_p * hidden + hidden * hidden + hidden * out_p)
    transcendentals = batch_p * (2 * hidden + out_p)
    bytes_accessed = int(
        x.size * x.dtype.itemsize
        + sum(a.size * a.dtype.itemsize for a in (w1, w2, w3, bias))
        + batch_p * out_p * jnp.dtype(out_dtype).itemsize)

    # ---- scoped-VMEM budget: double-buffered x + out tiles, resident
    # weights, plus headroom for f32 intermediates -------------------------
    need = (2 * batch_tile * in_p * x.dtype.itemsize
            + 2 * batch_tile * out_p * jnp.dtype(out_dtype).itemsize
            + sum(a.size * a.dtype.itemsize for a in (w1, w2, w3, bias))
            + 6 * batch_tile * max(hidden, out_p) * 4)
    vmem_limit = int(min(max(need + (4 << 20), 16 << 20), 60 << 20))
    # TODO(synk): for very large in_dim (x tile + w1 exceeding ~60 MiB) add a
    # K grid axis over in_p with an f32 accumulator instead of shrinking tiles.

    out = pl.pallas_call(
        _mlp_kernel,
        out_shape=jax.ShapeDtypeStruct((batch_p, out_p), out_dtype),
        grid_spec=pltpu.PrefetchScalarGridSpec(
            num_scalar_prefetch=0,
            grid=grid,
            in_specs=[
                pl.BlockSpec((batch_tile, in_p), lambda i: (i, 0)),  # x tile
                full2d(w1), full2d(w2), full2d(w3), full2d(bias),
            ],
            out_specs=pl.BlockSpec((batch_tile, out_p), lambda i: (i, 0)),
        ),
        compiler_params=pltpu.CompilerParams(
            dimension_semantics=("parallel",),
            vmem_limit_bytes=vmem_limit),
        cost_estimate=pl.CostEstimate(
            flops=flops,
            transcendentals=transcendentals,
            bytes_accessed=bytes_accessed),
    )(x, w1, w2, w3, bias)

    if return_padded:
        return out
    return out[:batch, :out_dim]


def init_operator_f_params(key, in_dim, out_dim):
    """Deterministic init mimicking PyTorch nn.Linear (uniform +/-1/sqrt(fan_in)).

    Weights returned as (fan_in, fan_out) -- transposed vs torch storage --
    so the kernel computes x @ W.  (Importers of real torch weights must
    transpose W and reshape b to (1, fan_out).)
    """
    keys = jax.random.split(key, 6)
    dims = [(in_dim, HIDDEN), (HIDDEN, HIDDEN), (HIDDEN, out_dim)]
    params = []
    for li, (fi, fo) in enumerate(dims):
        bound = 1.0 / jnp.sqrt(float(fi))
        w = jax.random.uniform(keys[2 * li], (fi, fo), jnp.float32, -bound, bound)
        b = jax.random.uniform(keys[2 * li + 1], (1, fo), jnp.float32, -bound, bound)
        params.extend([w, b])
    return tuple(params)


def _reference_forward(x, params):
    w1, b1, w2, b2, w3, b3 = params
    h = jax.nn.sigmoid(x @ w1 + b1)
    h = jax.nn.sigmoid(h @ w2 + b2)
    return jax.nn.sigmoid(h @ w3 + b3)


if __name__ == "__main__":
    key = jax.random.PRNGKey(0)
    k_param, k_x = jax.random.split(key)

    batch, in_dim, out_dim = 16, 32, 32
    raw_params = init_operator_f_params(k_param, in_dim, out_dim)
    x = jax.random.normal(k_x, (batch, in_dim), jnp.float32)
    ref = _reference_forward(x, raw_params)

    # strict-f32 path (tight tolerance, single-shot grid)
    prep_f32, od = prepare_params(raw_params, op_dtype=jnp.float32)
    out_f32 = jax.block_until_ready(operator_f_forward(x, prep_f32, out_dim=od))
    assert out_f32.shape == (batch, out_dim)
    assert jnp.allclose(out_f32, ref, atol=1e-5, rtol=1e-5), "f32 mismatch vs reference"

    # default bf16-operand path (f32 accumulation), looser tolerance
    prep_bf16, od = prepare_params(raw_params)
    out_bf16 = jax.block_until_ready(operator_f_forward(x, prep_bf16, out_dim=od))
    assert out_bf16.shape == (batch, out_dim)
    assert jnp.allclose(out_bf16, ref, atol=2e-2, rtol=2e-2), "bf16 mismatch vs reference"

    # multi-step grid path (exercises the tiled / megacore-parallel layout)
    out_tiled = jax.block_until_ready(
        operator_f_forward(x, prep_f32, out_dim=od, batch_tile=8))
    assert jnp.allclose(out_tiled, ref, atol=1e-5, rtol=1e-5), "tiled mismatch"

    # padded-output path (no post-kernel slice)
    out_pad = jax.block_until_ready(
        operator_f_forward(x, prep_bf16, out_dim=od, return_padded=True))
    assert out_pad.shape[1] % LANE == 0
    assert jnp.allclose(out_pad[:batch, :out_dim], ref, atol=2e-2, rtol=2e-2)

    print("KERNEL_OK")
</pallas_src>

<mosaic_0001>
module attributes {stable_mosaic.version = 11 : i64} {
  func.func @_mlp_kernel(%arg0: i32, %arg1: memref<16x128xf32, #tpu.memory_space<vmem>>, %arg2: memref<128x128xf32, #tpu.memory_space<vmem>>, %arg3: memref<128x128xf32, #tpu.memory_space<vmem>>, %arg4: memref<128x128xf32, #tpu.memory_space<vmem>>, %arg5: memref<3x128xf32, #tpu.memory_space<vmem>>, %arg6: memref<16x128xf32, #tpu.memory_space<vmem>>) attributes {dimension_semantics = [#tpu.dimension_semantics<parallel>], iteration_bounds = array<i64: 1>, scalar_prefetch = 0 : i64, scratch_operands = 0 : i64, tpu.core_type = #tpu.core_type<tc>, window_params = [{transform_indices = @transform_0, window_bounds = array<i64: 16, 128>}, {pipeline_mode = #tpu.pipeline_mode<synchronous>, transform_indices = @transform_1, window_bounds = array<i64: 128, 128>}, {pipeline_mode = #tpu.pipeline_mode<synchronous>, transform_indices = @transform_2, window_bounds = array<i64: 128, 128>}, {pipeline_mode = #tpu.pipeline_mode<synchronous>, transform_indices = @transform_3, window_bounds = array<i64: 128, 128>}, {pipeline_mode = #tpu.pipeline_mode<synchronous>, transform_indices = @transform_4, window_bounds = array<i64: 3, 128>}, {transform_indices = @transform_5, window_bounds = array<i64: 16, 128>}]} {
    %c0 = arith.constant 0 : index
    %c0_0 = arith.constant 0 : index
    %0 = vector.load %arg1[%c0, %c0_0] : memref<16x128xf32, #tpu.memory_space<vmem>>, vector<16x128xf32>
    %c0_1 = arith.constant 0 : index
    %c0_2 = arith.constant 0 : index
    %1 = vector.load %arg5[%c0_1, %c0_2] : memref<3x128xf32, #tpu.memory_space<vmem>>, vector<3x128xf32>
    %2 = vector.extract_strided_slice %1 {offsets = [0, 0], sizes = [1, 128], strides = [1, 1]} : vector<3x128xf32> to vector<1x128xf32>
    %3 = vector.extract_strided_slice %1 {offsets = [1, 0], sizes = [1, 128], strides = [1, 1]} : vector<3x128xf32> to vector<1x128xf32>
    %4 = vector.extract_strided_slice %1 {offsets = [2, 0], sizes = [1, 128], strides = [1, 1]} : vector<3x128xf32> to vector<1x128xf32>
    %c0_3 = arith.constant 0 : index
    %c0_4 = arith.constant 0 : index
    %5 = vector.load %arg2[%c0_3, %c0_4] : memref<128x128xf32, #tpu.memory_space<vmem>>, vector<128x128xf32>
    %cst = arith.constant dense<0.000000e+00> : vector<16x128xf32>
    %6 = tpu.matmul %0, %5, %cst {dimension_numbers = #tpu.dot_dimension_numbers<[1], [0], [0], [1], [0, 0, 1, 1], [], []>} : vector<16x128xf32>, vector<128x128xf32>, vector<16x128xf32> -> vector<16x128xf32>
    %7 = vector.broadcast %2 : vector<1x128xf32> to vector<16x128xf32>
    %8 = arith.addf %6, %7 : vector<16x128xf32>
    %cst_5 = arith.constant 5.000000e-01 : f32
    %9 = vector.broadcast %cst_5 : f32 to vector<16x128xf32>
    %10 = arith.mulf %9, %8 : vector<16x128xf32>
    %11 = math.tanh %10 : vector<16x128xf32>
    %cst_6 = arith.constant 5.000000e-01 : f32
    %12 = vector.broadcast %cst_6 : f32 to vector<16x128xf32>
    %13 = arith.mulf %12, %11 : vector<16x128xf32>
    %cst_7 = arith.constant 5.000000e-01 : f32
    %14 = vector.broadcast %cst_7 : f32 to vector<16x128xf32>
    %15 = arith.addf %13, %14 : vector<16x128xf32>
    %c0_8 = arith.constant 0 : index
    %c0_9 = arith.constant 0 : index
    %16 = vector.load %arg3[%c0_8, %c0_9] : memref<128x128xf32, #tpu.memory_space<vmem>>, vector<128x128xf32>
    %cst_10 = arith.constant dense<0.000000e+00> : vector<16x128xf32>
    %17 = tpu.matmul %15, %16, %cst_10 {dimension_numbers = #tpu.dot_dimension_numbers<[1], [0], [0], [1], [0, 0, 1, 1], [], []>} : vector<16x128xf32>, vector<128x128xf32>, vector<16x128xf32> -> vector<16x128xf32>
    %18 = vector.broadcast %3 : vector<1x128xf32> to vector<16x128xf32>
    %19 = arith.addf %17, %18 : vector<16x128xf32>
    %cst_11 = arith.constant 5.000000e-01 : f32
    %20 = vector.broadcast %cst_11 : f32 to vector<16x128xf32>
    %21 = arith.mulf %20, %19 : vector<16x128xf32>
    %22 = math.tanh %21 : vector<16x128xf32>
    %cst_12 = arith.constant 5.000000e-01 : f32
    %23 = vector.broadcast %cst_12 : f32 to vector<16x128xf32>
    %24 = arith.mulf %23, %22 : vector<16x128xf32>
    %cst_13 = arith.constant 5.000000e-01 : f32
    %25 = vector.broadcast %cst_13 : f32 to vector<16x128xf32>
    %26 = arith.addf %24, %25 : vector<16x128xf32>
    %c0_14 = arith.constant 0 : index
    %c0_15 = arith.constant 0 : index
    %27 = vector.load %arg4[%c0_14, %c0_15] : memref<128x128xf32, #tpu.memory_space<vmem>>, vector<128x128xf32>
    %cst_16 = arith.constant dense<0.000000e+00> : vector<16x128xf32>
    %28 = tpu.matmul %26, %27, %cst_16 {dimension_numbers = #tpu.dot_dimension_numbers<[1], [0], [0], [1], [0, 0, 1, 1], [], []>} : vector<16x128xf32>, vector<128x128xf32>, vector<16x128xf32> -> vector<16x128xf32>
    %29 = vector.broadcast %4 : vector<1x128xf32> to vector<16x128xf32>
    %30 = arith.addf %28, %29 : vector<16x128xf32>
    %cst_17 = arith.constant 5.000000e-01 : f32
    %31 = vector.broadcast %cst_17 : f32 to vector<16x128xf32>
    %32 = arith.mulf %31, %30 : vector<16x128xf32>
    %33 = math.tanh %32 : vector<16x128xf32>
    %cst_18 = arith.constant 5.000000e-01 : f32
    %34 = vector.broadcast %cst_18 : f32 to vector<16x128xf32>
    %35 = arith.mulf %34, %33 : vector<16x128xf32>
    %cst_19 = arith.constant 5.000000e-01 : f32
    %36 = vector.broadcast %cst_19 : f32 to vector<16x128xf32>
    %37 = arith.addf %35, %36 : vector<16x128xf32>
    %c0_20 = arith.constant 0 : index
    %c0_21 = arith.constant 0 : index
    %38 = vector.load %arg6[%c0_20, %c0_21] : memref<16x128xf32, #tpu.memory_space<vmem>>, vector<16x128xf32>
    tpu.vector_store %arg6[%c0_20, %c0_21], %37 {strides = array<i32>} : memref<16x128xf32, #tpu.memory_space<vmem>>, vector<16x128xf32>,
    return
  }
  func.func @transform_0(%arg0: i32) -> (i32, i32) {
    %c0_i32 = arith.constant 0 : i32
    %c0_i32_0 = arith.constant 0 : i32
    return %arg0, %c0_i32 : i32, i32
  }
  func.func @transform_1(%arg0: i32) -> (i32, i32) {
    %c0_i32 = arith.constant 0 : i32
    %c0_i32_0 = arith.constant 0 : i32
    %c0_i32_1 = arith.constant 0 : i32
    return %c0_i32, %c0_i32_0 : i32, i32
  }
  func.func @transform_2(%arg0: i32) -> (i32, i32) {
    %c0_i32 = arith.constant 0 : i32
    %c0_i32_0 = arith.constant 0 : i32
    %c0_i32_1 = arith.constant 0 : i32
    return %c0_i32, %c0_i32_0 : i32, i32
  }
  func.func @transform_3(%arg0: i32) -> (i32, i32) {
    %c0_i32 = arith.constant 0 : i32
    %c0_i32_0 = arith.constant 0 : i32
    %c0_i32_1 = arith.constant 0 : i32
    return %c0_i32, %c0_i32_0 : i32, i32
  }
  func.func @transform_4(%arg0: i32) -> (i32, i32) {
    %c0_i32 = arith.constant 0 : i32
    %c0_i32_0 = arith.constant 0 : i32
    %c0_i32_1 = arith.constant 0 : i32
    return %c0_i32, %c0_i32_0 : i32, i32
  }
  func.func @transform_5(%arg0: i32) -> (i32, i32) {
    %c0_i32 = arith.constant 0 : i32
    %c0_i32_0 = arith.constant 0 : i32
    return %arg0, %c0_i32 : i32, i32
  }
}

</mosaic_0001>

<bundles_post_ra>
// kernel: operator_f_forward.1
= control target key start
LH: loop header
LB: loop body
LE: loop exit
PB: predicated region body
PF: predicated region fallthrough
CT: control target
= control target key end

     0   :  { %10 = vsyncpa [#allocation3], 0  ;;  %s878_s0 = inlined_call_operand.vmem [shape: f32[16,128], index: 0, kind: input, shape index: {}]   ;;  %s879_s1 = inlined_call_operand.hbm [shape: f32[128,128], index: 1, kind: input, shape index: {}]   ;;  %s880_s2 = inlined_call_operand.hbm [shape: f32[128,128], index: 2, kind: input, shape index: {}]   ;;  %s881_s3 = inlined_call_operand.hbm [shape: f32[128,128], index: 3, kind: input, shape index: {}]   ;;  %s882_s4 = inlined_call_operand.vmem [shape: f32[3,128], index: 4, kind: input, shape index: {}]   ;;  %s883_s5 = inlined_call_operand.hbm [shape: f32[16,128], index: 5, kind: output, shape index: {}]  }
   0x1   :  { %11 = vsyncpa [#allocation6], 0 }
   0x2   :  { %12 = vsyncpa [#allocation4], 0  ;;  %s761_s18 = smov [#allocation5]   ;;  %s762_s20 = smov [#allocation2]  }
   0x3   :  { %s32_s19 = sshll.u32 %s761_s18, 4  ;;  %s20_s21 = sshll.u32 %s762_s20, 4  ;;  %s33_s19 = int_to_ptr.vmem [resolvable:$true] %s32_s19  ;;  %s797_s21 = int_to_ptr.vmem [resolvable:$true] %s20_s21 }
   0x4   :  { %s667_s24 = scalar_lea.hbm %s880_s2, 2048 }
   0x5   :  { %p668_p0 = scmp.ne.s32.totalorder %s880_s2, %s667_s24  ;;  %p671_p1 = scmp.lt.u32.totalorder %s667_s24, %s880_s2 }
   0x7   :  { %p673_p2 = pnand %p671_p1, %p668_p0 }
   0x9   :  { %676 = shalt.err (!%p673_p2)
}
   0xa   :  { %s677_s29 = scalar_lea.vmem %s33_s19, 2048  ;;  %p682_p4 = scmp.lt.s32.totalorder %s33_s19, %s33_s19 }
   0xb   :  { %p678_p3 = scmp.ne.s32.totalorder %s33_s19, %s677_s29  ;;  %p683_p5 = scmp.lt.s32.totalorder %s677_s29, %s677_s29 }
   0xd   :  { %p684_p6 = por %p683_p5, %p682_p4 }
   0xf   :  { %p685_p7 = pnand %p684_p6, %p678_p3 }
  0x11   :  { %688 = shalt.err (!%p685_p7)
}
  0x12   :  { %s763_s30 = smov 128   ;;  %s764_s6 = smov 8  }
  0x13   :  { %38 = dma.hbm_to_vmem [thread:$0]  %s880_s2, 2048, %s33_s19, [#allocation6], %s763_s30, %s763_s30, %s764_s6  }
  0x14   :  { %s689_s11 = scalar_lea.hbm %s879_s1, 2048 }
  0x15   :  { %p690_p8 = scmp.ne.s32.totalorder %s879_s1, %s689_s11  ;;  %p693_p9 = scmp.lt.u32.totalorder %s689_s11, %s879_s1 }
  0x17   :  { %p695_p10 = pnand %p693_p9, %p690_p8 }
  0x19   :  { %698 = shalt.err (!%p695_p10)
}
  0x1a   :  { %s699_s16 = scalar_lea.vmem %s797_s21, 2048  ;;  %p704_p12 = scmp.lt.s32.totalorder %s797_s21, %s797_s21 }
  0x1b   :  { %p700_p11 = scmp.ne.s32.totalorder %s797_s21, %s699_s16  ;;  %p705_p13 = scmp.lt.s32.totalorder %s699_s16, %s699_s16 }
  0x1d   :  { %p706_p0 = por %p705_p13, %p704_p12 }
  0x1f   :  { %p707_p1 = pnand %p706_p0, %p700_p11 }
  0x21   :  { %710 = shalt.err (!%p707_p1)
}
  0x22   :  { %26 = dma.hbm_to_vmem [thread:$0]  %s879_s1, 2048, %s797_s21, [#allocation3], %s763_s30, %s763_s30, %s764_s6  }
  0x23   :  { %s765_s18 = smov [#allocation7]   ;;  %s711_s23 = scalar_lea.hbm %s881_s3, 2048 }
  0x24   :  { %s44_s19 = sshll.u32 %s765_s18, 4  ;;  %p712_p2 = scmp.ne.s32.totalorder %s881_s3, %s711_s23  ;;  %s45_s19 = int_to_ptr.vmem [resolvable:$true] %s44_s19 }
  0x25   :  { %p715_p3 = scmp.lt.u32.totalorder %s711_s23, %s881_s3 }
  0x27   :  { %p717_p4 = pnand %p715_p3, %p712_p2 }
  0x29   :  { %720 = shalt.err (!%p717_p4)
}
  0x2a   :  { %s721_s28 = scalar_lea.vmem %s45_s19, 2048  ;;  %p726_p6 = scmp.lt.s32.totalorder %s45_s19, %s45_s19 }
  0x2b   :  { %p722_p5 = scmp.ne.s32.totalorder %s45_s19, %s721_s28  ;;  %p727_p7 = scmp.lt.s32.totalorder %s721_s28, %s721_s28 }
  0x2d   :  { %p728_p8 = por %p727_p7, %p726_p6 }
  0x2f   :  { %p729_p9 = pnand %p728_p8, %p722_p5 }
  0x31   :  { %732 = shalt.err (!%p729_p9)
}
  0x32   :  { %50 = dma.hbm_to_vmem [thread:$0]  %s881_s3, 2048, %s45_s19, [#allocation6], %s763_s30, %s763_s30, %s764_s6  }
  0x33   :  { %755 = dma.done.wait [#allocation3], 2048  }
  0x34   :  { %756 = vsyncadd [#allocation3], 4294965248 }
  0x35   :  { %757 = dma.done.wait [#allocation6], 4096  }
  0x36   :  { %758 = vsyncadd [#allocation6], 4294963200  ;;  %v65_v0 = vld [vmem:[#allocation2] sm:$0xff]  ;;  %v66_v1 = vld [vmem:[#allocation2 + $0x8] sm:$0xff]  ;;  %v81_v59 = vlaneseq }
  0x37   :  { %v67_v2 = vld [vmem:[#allocation2 + $0x10] sm:$0xff]  ;;  %v553_v3 = vpack.c.bf16 %v66_v1, %v65_v0  ;;  %v68_v4 = vld [vmem:[#allocation2 + $0x18] sm:$0xff]  ;;  %v69_v6 = vld [vmem:[#allocation2 + $0x20] sm:$0xff] }
  0x38   :  { %v557_v5 = vpack.c.bf16 %v68_v4, %v67_v2  ;;  %v70_v7 = vld [vmem:[#allocation2 + $0x28] sm:$0xff]  ;;  %v71_v9 = vld [vmem:[#allocation2 + $0x30] sm:$0xff]  ;;  %v72_v10 = vld [vmem:[#allocation2 + $0x38] sm:$0xff]  ;;  %v855_v60 = vshrl.u32 %v81_v59, 7 }
  0x39   :  { %554 = vmatprep.subr.bf16.mxu0 %v553_v3  ;;  %v561_v8 = vpack.c.bf16 %v70_v7, %v69_v6  ;;  %v62_v11 = vld [vmem:[%s878_s0] sm:$0xff]  ;;  %v168_v12 = vld [vmem:[#allocation5] sm:$0xff]  ;;  %v169_v13 = vld [vmem:[#allocation5 + $0x8] sm:$0xff]  ;;  %v565_v20 = vpack.c.bf16 %v72_v10, %v71_v9 }
  0x3a   :  { %556 = vmatpush3.bf16.msra.mxu0 %v553_v3  ;;  %480 = vmatprep.mubr.f32.mxu0 %v62_v11  ;;  %v170_v14 = vld [vmem:[#allocation5 + $0x10] sm:$0xff]  ;;  %v585_v15 = vpack.c.bf16 %v169_v13, %v168_v12  ;;  %v171_v16 = vld [vmem:[#allocation5 + $0x18] sm:$0xff]  ;;  %v172_v18 = vld [vmem:[#allocation5 + $0x20] sm:$0xff]  ;;  %v83_v61 = vsub.s32 0, %v855_v60 }
  0x3b   :  { %558 = vmatprep.subr.bf16.mxu0 %v557_v5  ;;  %v589_v17 = vpack.c.bf16 %v171_v16, %v170_v14  ;;  %v173_v19 = vld [vmem:[#allocation5 + $0x28] sm:$0xff]  ;;  %v73_v21 = vld [vmem:[#allocation2 + $0x40] sm:$0xff]  ;;  %v75_v25 = vld [vmem:[#allocation2 + $0x50] sm:$0xff] }
  0x3c   :  { %586 = vmatprep.subr.bf16.mxu1 %v585_v15  ;;  %v74_v22 = vld [vmem:[#allocation2 + $0x48] sm:$0xff]  ;;  %v593_v23 = vpack.c.bf16 %v173_v19, %v172_v18  ;;  %v76_v26 = vld [vmem:[#allocation2 + $0x58] sm:$0xff]  ;;  %v77_v28 = vld [vmem:[#allocation2 + $0x60] sm:$0xff] }
  0x3d   :  { %588 = vmatpush3.bf16.msra.mxu1 %v585_v15  ;;  %v569_v24 = vpack.c.bf16 %v74_v22, %v73_v21  ;;  %v573_v27 = vpack.c.bf16 %v76_v26, %v75_v25  ;;  %v78_v29 = vld [vmem:[#allocation2 + $0x68] sm:$0xff]  ;;  %v79_v31 = vld [vmem:[#allocation2 + $0x70] sm:$0xff]  ;;  %v80_v32 = vld [vmem:[#allocation2 + $0x78] sm:$0xff] }
  0x3e   :  { %560 = vmatpush3.bf16.msra.mxu0 %v557_v5  ;;  %590 = vmatprep.subr.bf16.mxu1 %v589_v17  ;;  %v577_v30 = vpack.c.bf16 %v78_v29, %v77_v28  ;;  %v581_v33 = vpack.c.bf16 %v80_v32, %v79_v31  ;;  %v63_v34 = vld [vmem:[%s878_s0 + $0x8] sm:$0xff]  ;;  %v174_v35 = vld [vmem:[#allocation5 + $0x30] sm:$0xff]  ;;  %v176_v38 = vld [vmem:[#allocation5 + $0x40] sm:$0xff] }
  0x3f   :  { %562 = vmatprep.subr.bf16.mxu0 %v561_v8  ;;  %v175_v36 = vld [vmem:[#allocation5 + $0x38] sm:$0xff]  ;;  %v177_v39 = vld [vmem:[#allocation5 + $0x48] sm:$0xff]  ;;  %v178_v41 = vld [vmem:[#allocation5 + $0x50] sm:$0xff] }
  0x40   :  { %v597_v37 = vpack.c.bf16 %v175_v36, %v174_v35  ;;  %v601_v40 = vpack.c.bf16 %v177_v39, %v176_v38  ;;  %v179_v42 = vld [vmem:[#allocation5 + $0x58] sm:$0xff]  ;;  %v180_v44 = vld [vmem:[#allocation5 + $0x60] sm:$0xff]  ;;  %v181_v45 = vld [vmem:[#allocation5 + $0x68] sm:$0xff] }
  0x41   :  { %592 = vmatpush3.bf16.msra.mxu1 %v589_v17  ;;  %v605_v43 = vpack.c.bf16 %v179_v42, %v178_v41  ;;  %v609_v46 = vpack.c.bf16 %v181_v45, %v180_v44  ;;  %v182_v47 = vld [vmem:[#allocation5 + $0x70] sm:$0xff]  ;;  %v183_v48 = vld [vmem:[#allocation5 + $0x78] sm:$0xff]  ;;  %v271_v50 = vld [vmem:[#allocation7] sm:$0xff]  ;;  %v289_v41 = vsub.s32 2, %v855_v60 }
  0x42   :  { %564 = vmatpush3.bf16.msra.mxu0 %v561_v8  ;;  %594 = vmatprep.subr.bf16.mxu1 %v593_v23  ;;  %v613_v49 = vpack.c.bf16 %v183_v48, %v182_v47  ;;  %v272_v51 = vld [vmem:[#allocation7 + $0x8] sm:$0xff]  ;;  %v273_v52 = vld [vmem:[#allocation7 + $0x10] sm:$0xff]  ;;  %v274_v54 = vld [vmem:[#allocation7 + $0x18] sm:$0xff] }
  0x43   :  { %566 = vmatprep.subr.bf16.mxu0 %v565_v20  ;;  %v617_v53 = vpack.c.bf16 %v272_v51, %v271_v50  ;;  %v621_v55 = vpack.c.bf16 %v274_v54, %v273_v52  ;;  %v275_v56 = vld [vmem:[#allocation7 + $0x20] sm:$0xff]  ;;  %v276_v57 = vld [vmem:[#allocation7 + $0x28] sm:$0xff]  ;;  %v64_v62 = vld [vmem:[%s882_s4] sm:$0x7]  ;;  %s766_s4 = smov [#allocation8]  }
  0x44   :  { %v625_v58 = vpack.c.bf16 %v276_v57, %v275_v56  ;;  %v84_v63 = vrot.slane %v64_v62, %v83_v61  ;;  %v277_v12 = vld [vmem:[#allocation7 + $0x30] sm:$0xff]  ;;  %v278_v13 = vld [vmem:[#allocation7 + $0x38] sm:$0xff]  ;;  %v279_v15 = vld [vmem:[#allocation7 + $0x40] sm:$0xff]  ;;  %v290_v42 = vrot.slane %v64_v62, %v289_v41  ;;  %s381_s10 = sshll.u32 %s766_s4, 4  ;;  %s382_s10 = int_to_ptr.vmem [resolvable:$true] %s381_s10 }
  0x45   :  { %596 = vmatpush3.bf16.msra.mxu1 %v593_v23  ;;  %v629_v14 = vpack.c.bf16 %v278_v13, %v277_v12  ;;  %v280_v16 = vld [vmem:[#allocation7 + $0x48] sm:$0xff]  ;;  %v281_v18 = vld [vmem:[#allocation7 + $0x50] sm:$0xff]  ;;  %v282_v19 = vld [vmem:[#allocation7 + $0x58] sm:$0xff]  ;;  %s733_s11 = scalar_lea.vmem %s382_s10, 256  ;;  %p738_p11 = scmp.lt.s32.totalorder %s382_s10, %s382_s10 }
  0x46   :  { %568 = vmatpush3.bf16.msra.mxu0 %v565_v20  ;;  %598 = vmatprep.subr.bf16.mxu1 %v597_v37  ;;  %v633_v17 = vpack.c.bf16 %v280_v16, %v279_v15  ;;  %v637_v20 = vpack.c.bf16 %v282_v19, %v281_v18  ;;  %v283_v21 = vld [vmem:[#allocation7 + $0x60] sm:$0xff]  ;;  %v284_v22 = vld [vmem:[#allocation7 + $0x68] sm:$0xff]  ;;  %v286_v25 = vld [vmem:[#allocation7 + $0x78] sm:$0xff]  ;;  %p734_p10 = scmp.ne.s32.totalorder %s382_s10, %s733_s11  ;;  %p739_p12 = scmp.lt.s32.totalorder %s733_s11, %s733_s11 }
  0x47   :  { %570 = vmatprep.subr.bf16.mxu0 %v569_v24  ;;  %v641_v23 = vpack.c.bf16 %v284_v22, %v283_v21 }
  0x48   :  { %p740_p13 = por %p739_p12, %p738_p11 }
  0x49   :  { %600 = vmatpush3.bf16.msra.mxu1 %v597_v37 }
  0x4a   :  { %572 = vmatpush3.bf16.msra.mxu0 %v569_v24  ;;  %602 = vmatprep.subr.bf16.mxu1 %v601_v40  ;;  %v285_v24 = vld [vmem:[#allocation7 + $0x70] sm:$0xff]  ;;  %p741_p0 = pnand %p740_p13, %p734_p10 }
  0x4b   :  { %574 = vmatprep.subr.bf16.mxu0 %v573_v27  ;;  %v645_v26 = vpack.c.bf16 %v286_v25, %v285_v24 }
  0x4d   :  { %604 = vmatpush3.bf16.msra.mxu1 %v601_v40 }
  0x4e   :  { %576 = vmatpush3.bf16.msra.mxu0 %v573_v27  ;;  %606 = vmatprep.subr.bf16.mxu1 %v605_v43  ;;  %v186_v27 = vsub.s32 1, %v855_v60 }
  0x4f   :  { %578 = vmatprep.subr.bf16.mxu0 %v577_v30 }
  0x50   :  { %v187_v28 = vrot.slane %v64_v62, %v186_v27 }
  0x51   :  { %608 = vmatpush3.bf16.msra.mxu1 %v605_v43 }
  0x52   :  { %580 = vmatpush3.bf16.msra.mxu0 %v577_v30  ;;  %610 = vmatprep.subr.bf16.mxu1 %v609_v46 }
  0x53   :  { %582 = vmatprep.subr.bf16.mxu0 %v581_v33 }
  0x55   :  { %612 = vmatpush3.bf16.msra.mxu1 %v609_v46 }
  0x56   :  { %584 = vmatpush3.bf16.msra.mxu0 %v581_v33  ;;  %614 = vmatprep.subr.bf16.mxu1 %v613_v49 }
  0x57   :  { %618 = vmatprep.subr.bf16.mxu0 %v617_v53 }
  0x59   :  { %481 = vmatmul.mubr.f32.vlgmr.msra.gmra.mrb[0].mxu0 %v63_v34  ;;  %616 = vmatpush3.bf16.msra.mxu1 %v613_v49 }
  0x5a   :  { %620 = vmatpush3.bf16.msra.mxu0 %v617_v53 }
  0x5b   :  { %622 = vmatprep.subr.bf16.mxu0 %v621_v55 }
  0x5e   :  { %624 = vmatpush3.bf16.msra.mxu0 %v621_v55 }
  0x5f   :  { %626 = vmatprep.subr.bf16.mxu0 %v625_v58 }
  0x62   :  { %628 = vmatpush3.bf16.msra.mxu0 %v625_v58 }
  0x63   :  { %630 = vmatprep.subr.bf16.mxu0 %v629_v14 }
  0x66   :  { %632 = vmatpush3.bf16.msra.mxu0 %v629_v14 }
  0x67   :  { %634 = vmatprep.subr.bf16.mxu0 %v633_v17 }
  0x6a   :  { %636 = vmatpush3.bf16.msra.mxu0 %v633_v17 }
  0x6b   :  { %638 = vmatprep.subr.bf16.mxu0 %v637_v20 }
  0x6e   :  { %640 = vmatpush3.bf16.msra.mxu0 %v637_v20 }
  0x6f   :  { %642 = vmatprep.subr.bf16.mxu0 %v641_v23 }
  0x72   :  { %644 = vmatpush3.bf16.msra.mxu0 %v641_v23 }
  0x73   :  { %646 = vmatprep.subr.bf16.mxu0 %v645_v26 }
  0x76   :  { %648 = vmatpush3.bf16.msra.mxu0 %v645_v26 }
 0x12c   :  { %v482_v0 = vpop.f32.mrb[0].mxu0 }
 0x12d   :  { %v157_v1 = vadd.f32 %v482_v0, %v84_v63  ;;  %v151_v2 = vpop.f32.mrb[1].mxu0 }
 0x12e   :  { %v152_v3 = vadd.f32 %v151_v2, %v84_v63 }
 0x12f   :  { %v161_v4 = vmul.f32 0.5, %v157_v1 }
 0x130   :  { %v160_v5 = vmul.f32 0.5, %v152_v3 }
 0x131   :  { %655 = vtanh.f32 %v161_v4 }
 0x132   :  { %657 = vtanh.f32 %v160_v5 }
 0x13b   :  { %v656_v6 = vpop.eup %655 }
 0x13c   :  { %v658_v7 = vpop.eup %657  ;;  %v165_v8 = vmul.f32 0.5, %v656_v6 }
 0x13d   :  { %v164_v9 = vmul.f32 0.5, %v658_v7 }
 0x13e   :  { %v167_v11 = vadd.f32 0.5, %v165_v8 }
 0x13f   :  { %v166_v10 = vadd.f32 0.5, %v164_v9 }
 0x141   :  { %515 = vmatprep.mubr.f32.mxu1 %v166_v10 }
 0x142   :  { %516 = vmatmul.mubr.f32.vlgmr.msra.gmra.mrb[0].mxu1 %v167_v11 }
 0x215   :  { %v517_v29 = vpop.f32.mrb[0].mxu1 }
 0x216   :  { %v260_v30 = vadd.f32 %v517_v29, %v187_v28  ;;  %v254_v31 = vpop.f32.mrb[1].mxu1 }
 0x217   :  { %v255_v32 = vadd.f32 %v254_v31, %v187_v28 }
 0x218   :  { %v264_v33 = vmul.f32 0.5, %v260_v30 }
 0x219   :  { %v263_v34 = vmul.f32 0.5, %v255_v32 }
 0x21a   :  { %659 = vtanh.f32 %v264_v33 }
 0x21b   :  { %661 = vtanh.f32 %v263_v34 }
 0x224   :  { %v660_v35 = vpop.eup %659 }
 0x225   :  { %v662_v36 = vpop.eup %661  ;;  %v268_v37 = vmul.f32 0.5, %v660_v35 }
 0x226   :  { %v267_v38 = vmul.f32 0.5, %v662_v36 }
 0x227   :  { %v270_v40 = vadd.f32 0.5, %v268_v37 }
 0x228   :  { %v269_v39 = vadd.f32 0.5, %v267_v38 }
 0x22a   :  { %550 = vmatprep.mubr.f32.mxu0 %v269_v39 }
 0x22b   :  { %551 = vmatmul.mubr.f32.vlgmr.msra.gmra.mrb[2].mxu0 %v270_v40 }
 0x2fe   :  { %v552_v43 = vpop.f32.mrb[2].mxu0 }
 0x2ff   :  { %v363_v44 = vadd.f32 %v552_v43, %v290_v42  ;;  %v357_v45 = vpop.f32.mrb[3].mxu0 }
 0x300   :  { %v358_v46 = vadd.f32 %v357_v45, %v290_v42 }
 0x301   :  { %v367_v47 = vmul.f32 0.5, %v363_v44 }
 0x302   :  { %v366_v48 = vmul.f32 0.5, %v358_v46 }
 0x303   :  { %663 = vtanh.f32 %v367_v47 }
 0x304   :  { %665 = vtanh.f32 %v366_v48 }
 0x30d   :  { %v664_v49 = vpop.eup %663 }
 0x30e   :  { %v666_v50 = vpop.eup %665  ;;  %v371_v51 = vmul.f32 0.5, %v664_v49 }
 0x30f   :  { %v370_v52 = vmul.f32 0.5, %v666_v50 }
 0x310   :  { %v373_v53 = vadd.f32 0.5, %v371_v51 }
 0x311   :  { %v372_v54 = vadd.f32 0.5, %v370_v52 }
 0x312   :  { %375 = vst [vmem:[#allocation8 + $0x8] sm:$0xff] %v373_v53 }
 0x313   :  { %374 = vst [vmem:[#allocation8] sm:$0xff] %v372_v54 }
 0x314   :  { %744 = shalt.err (!%p741_p0)
}
 0x315   :  { %s745_s14 = scalar_lea.hbm %s883_s5, 256 }
 0x316   :  { %p746_p1 = scmp.ne.s32.totalorder %s883_s5, %s745_s14  ;;  %p749_p2 = scmp.lt.u32.totalorder %s745_s14, %s883_s5 }
 0x318   :  { %p751_p3 = pnand %p749_p2, %p746_p1 }
 0x31a   :  { %754 = shalt.err (!%p751_p3)
}
 0x31b   :  { %387 = dma.vmem_to_hbm [thread:$0]  %s382_s10, 256, %s883_s5, [#allocation4], %s763_s30, %s763_s30, %s764_s6  }
 0x31c   :  { %759 = dma.done.wait [#allocation4], 256  }
 0x31d   :  { %760 = vsyncadd [#allocation4], 4294967040 }
 0x31e   :  { %391 = vsyncpa [#allocation3], 1 }
 0x31f   :  { %392 = vsyncpa [#allocation6], 1 }
 0x320   :  { %393 = vsyncpa [#allocation4], 1 }

</bundles_post_ra>
